<compile_context>
chip_gen: v5e
topology: v5e:2x2
jax: 0.10.0
libtpu: 0.0.40
codegen_flags: <defaults>
</compile_context>

<pallas_src>
import numpy as np
import jax
import jax.numpy as jnp
from jax import lax
from jax.experimental import pallas as pl
from jax.experimental.pallas import tpu as pltpu


# ----------------------------------------------------------------------------
# LTI state-space matrices (Legendre memory) + ZOH discretization (numpy, f64)
# ----------------------------------------------------------------------------
def _expm(M):
    """Matrix exponential via scaling-and-squaring + Taylor (float64)."""
    M = np.asarray(M, dtype=np.float64)
    n = M.shape[0]
    norm = np.linalg.norm(M, ord=np.inf)
    k = max(0, int(np.ceil(np.log2(max(norm, 1e-16)))) + 1)
    Ms = M / (2.0 ** k)
    E = np.eye(n)
    term = np.eye(n)
    for i in range(1, 25):
        term = term @ Ms / i
        E = E + term
    for _ in range(k):
        E = E @ E
    return E


def state_space_matrices(memory_size, theta):
    """Continuous LMU (A, B) then zero-order-hold discretization with dt=1."""
    Q = np.arange(memory_size, dtype=np.float64).reshape(-1, 1)
    R = (2 * Q + 1) / theta
    i, j = np.meshgrid(Q, Q, indexing="ij")
    A = R * np.where(i < j, -1.0, (-1.0) ** (i - j + 1))
    B = R * (-1.0) ** Q                                  # (memory, 1)
    # ZOH: exp([[A, B], [0, 0]] * dt) -> [[Ad, Bd], [0, I]]
    n = memory_size
    aug = np.zeros((n + 1, n + 1), dtype=np.float64)
    aug[:n, :n] = A
    aug[:n, n:] = B
    E = _expm(aug * 1.0)
    return E[:n, :n].astype(np.float32), E[:n, n:].astype(np.float32)


# ----------------------------------------------------------------------------
# Pallas kernel: one grid step == one (batch block, time chunk) of recurrence
# ----------------------------------------------------------------------------
def lmu_chunk_kernel(xh_ref, xm_ref, Wm_ref, Wh_ref, hseq_ref, s_scr):
    """Serial LMU recurrence over one chunk of TB timesteps.

    xh_ref   : (TB, Bblk, H)   x_t @ W_x^T            (time-parallel, hoisted)
    xm_ref   : (TB, Bblk, M)   x_t @ (e_x^T B_row)    (time-parallel, hoisted)
    Wm_ref   : (H+M, M)        [[e_h^T B_row], [A^T + e_m^T B_row]]
    Wh_ref   : (H+M, H)        [[W_h^T], [W_m^T]]
    hseq_ref : (TB, Bblk, H)   output hidden states
    s_scr    : (Bblk, H+M)     carried state [h | m] across time chunks
    """
    H = xh_ref.shape[-1]
    TB = xh_ref.shape[0]

    # h_0 = 0, m_0 = 0 at the start of each batch block's time sequence.
    # Gate on the *time-chunk* axis only, so state never leaks across batch
    # blocks (time is the inner grid axis / per-core with megacore sharding).
    @pl.when(pl.program_id(1) == 0)
    def _():
        s_scr[...] = jnp.zeros_like(s_scr)

    # Static unroll is fine at TB<=~16; for larger TB switch to
    # lax.fori_loop(0, TB, body, unroll=4..8) to bound live ranges.
    for t in range(TB):
        # m_t = [h_{t-1}, m_{t-1}] @ [[EhB],[Aeff]] + x_t @ ExB
        m_new = xm_ref[t] + jnp.dot(
            s_scr[...], Wm_ref[...], preferred_element_type=jnp.float32)
        s_scr[:, H:] = m_new
        # h_t = tanh(x_t @ W_x^T + [h_{t-1}, m_t] @ [[W_h^T],[W_m^T]])
        h_new = jnp.tanh(xh_ref[t] + jnp.dot(
            s_scr[...], Wh_ref[...], preferred_element_type=jnp.float32))
        s_scr[:, :H] = h_new
        hseq_ref[t] = h_new


def lmu_model_forward(x, params, *, time_block=None, batch_block=None):
    """x: [batch, seq, input_size] -> [batch, seq, output_size]."""
    B, T, I = x.shape
    H = params["W_x"].shape[0]
    M = params["A"].shape[0]
    O = params["W_cls"].shape[0]

    TB = T if time_block is None else time_block
    assert T % TB == 0, "seq length must divide into time chunks"

    # Pad batch to a multiple of 8 (f32 sublane).  At non-toy scale raise this
    # to a 128-row (v5e) / 256-row (v6e/v7x) tile so the MXU is row-saturated.
    Bp = max(8, ((B + 7) // 8) * 8)
    Bblk = Bp if batch_block is None else batch_block
    assert Bp % Bblk == 0 and Bblk % 8 == 0, "bad batch block"

    x = x.astype(jnp.float32)
    if Bp != B:
        # Zero-padded rows stay exactly zero through the recurrence.
        x = jnp.pad(x, ((0, Bp - B), (0, 0), (0, 0)))

    # Fold the rank-1 `u @ B^T` outer products into the weights:
    #   m_t = m@(A^T + e_m^T B_r) + h@(e_h^T B_r) + x_t@(e_x^T B_r)
    B_row = params["B"].reshape(1, M)                       # (1, M)
    Aeff = params["A"].T + params["e_m"].T @ B_row          # (M, M)
    EhB = params["e_h"].T @ B_row                           # (H, M)
    ExB = params["e_x"].T @ B_row                           # (I, M)

    # Pre-stack weights so each step issues 2 dependent MXU matmuls not 4.
    Wm_stack = jnp.concatenate([EhB, Aeff], axis=0)         # (H+M, M)
    Wh_stack = jnp.concatenate([params["W_h"].T,
                                params["W_m"].T], axis=0)   # (H+M, H)

    # Hoist the time-parallel input projections out of the serial recurrence,
    # emitted directly time-major (x is never transposed in HBM).
    xh = jnp.einsum("bti,hi->tbh", x, params["W_x"])        # (T, Bp, H)
    xm = jnp.einsum("bti,im->tbm", x, ExB)                  # (T, Bp, M)

    # Constant weights: single-buffered (they map to block (0,0) every step).
    def const_spec(shape):
        return pl.BlockSpec(shape, lambda b, c: (0,) * len(shape),
                            pipeline_mode=pl.Buffered(1))

    grid_spec = pltpu.PrefetchScalarGridSpec(
        num_scalar_prefetch=0,
        # (batch blocks, time chunks): time is the inner, serial axis.
        grid=(Bp // Bblk, T // TB),
        in_specs=[
            pl.BlockSpec((TB, Bblk, H), lambda b, c: (c, b, 0)),  # xh
            pl.BlockSpec((TB, Bblk, M), lambda b, c: (c, b, 0)),  # xm
            const_spec((H + M, M)),                                # Wm_stack
            const_spec((H + M, H)),                                # Wh_stack
        ],
        out_specs=pl.BlockSpec((TB, Bblk, H), lambda b, c: (c, b, 0)),
        scratch_shapes=[
            pltpu.VMEM((Bblk, H + M), jnp.float32),   # [h | m] carried state
        ],
    )

    # At non-toy sizes also set vmem_limit_bytes against the target chip
    # (64 MiB physical on v7x, 16/32 MiB scoped defaults on v5e/v6e).
    h_seq = pl.pallas_call(
        lmu_chunk_kernel,
        out_shape=jax.ShapeDtypeStruct((T, Bp, H), jnp.float32),
        grid_spec=grid_spec,
        compiler_params=pltpu.CompilerParams(
            dimension_semantics=("parallel", "arbitrary")),
    )(xh, xm, Wm_stack, Wh_stack)

    # Classifier: one lane-dense batched matmul, outside the serial loop,
    # producing the batch-major [B, T, O] output directly (no transpose pass).
    out = jnp.einsum("tbh,oh->bto", h_seq, params["W_cls"]) + params["b_cls"]
    return out[:B]


# ----------------------------------------------------------------------------
# Pure-JAX reference (mirrors the PyTorch forward exactly)
# ----------------------------------------------------------------------------
def lmu_model_reference(x, params):
    Bsz, T, I = x.shape
    H = params["W_x"].shape[0]
    M = params["A"].shape[0]

    def step(carry, x_t):
        h, m = carry
        u = (x_t @ params["e_x"].T + h @ params["e_h"].T + m @ params["e_m"].T)
        m = m @ params["A"].T + u @ params["B"].T
        h = jnp.tanh(x_t @ params["W_x"].T + h @ params["W_h"].T
                     + m @ params["W_m"].T)
        out = h @ params["W_cls"].T + params["b_cls"]
        return (h, m), out

    h0 = jnp.zeros((Bsz, H), jnp.float32)
    m0 = jnp.zeros((Bsz, M), jnp.float32)
    _, outs = lax.scan(step, (h0, m0), jnp.transpose(x, (1, 0, 2)))
    return jnp.transpose(outs, (1, 0, 2))


# ----------------------------------------------------------------------------
# Deterministic parameter init (matches the module's __init__ shapes)
# ----------------------------------------------------------------------------
def init_params(key, input_size, output_size, hidden_size, memory_size, theta):
    ks = jax.random.split(key, 7)
    A, B = state_space_matrices(memory_size, theta)

    def lecun_uniform(k, shape):
        fan_in = shape[-1]
        limit = np.sqrt(3.0 / fan_in)
        return jax.random.uniform(k, shape, jnp.float32, -limit, limit)

    def xavier_normal(k, shape):
        fan_out, fan_in = shape
        std = np.sqrt(2.0 / (fan_in + fan_out))
        return std * jax.random.normal(k, shape, jnp.float32)

    bound = 1.0 / np.sqrt(hidden_size)
    return {
        "A": jnp.asarray(A),                                   # (M, M)
        "B": jnp.asarray(B),                                   # (M, 1)
        "e_x": lecun_uniform(ks[0], (1, input_size)),
        "e_h": lecun_uniform(ks[1], (1, hidden_size)),
        "e_m": jnp.zeros((1, memory_size), jnp.float32),
        "W_x": xavier_normal(ks[2], (hidden_size, input_size)),
        "W_h": xavier_normal(ks[3], (hidden_size, hidden_size)),
        "W_m": xavier_normal(ks[4], (hidden_size, memory_size)),
        "W_cls": jax.random.uniform(ks[5], (output_size, hidden_size),
                                    jnp.float32, -bound, bound),
        "b_cls": jax.random.uniform(ks[6], (output_size,),
                                    jnp.float32, -bound, bound),
    }


if __name__ == "__main__":
    batch, seq = 2, 8
    input_size, output_size = 4, 10
    hidden_size, memory_size, theta = 32, 32, 8

    key = jax.random.PRNGKey(0)
    pkey, xkey = jax.random.split(key)
    params = init_params(pkey, input_size, output_size,
                         hidden_size, memory_size, theta)
    x = jax.random.normal(xkey, (batch, seq, input_size), jnp.float32)

    out = lmu_model_forward(x, params)
    out = jax.block_until_ready(out)

    ref = jax.block_until_ready(lmu_model_reference(x, params))
    assert out.shape == (batch, seq, output_size)
    np.testing.assert_allclose(np.asarray(out), np.asarray(ref),
                               rtol=2e-3, atol=5e-4)
    print("KERNEL_OK")
</pallas_src>

<mosaic_0001>
module attributes {stable_mosaic.version = 11 : i64} {
  func.func @lmu_chunk_kernel(%arg0: i32, %arg1: i32, %arg2: memref<8x8x32xf32, #tpu.memory_space<vmem>>, %arg3: memref<8x8x32xf32, #tpu.memory_space<vmem>>, %arg4: memref<64x32xf32, #tpu.memory_space<vmem>>, %arg5: memref<64x32xf32, #tpu.memory_space<vmem>>, %arg6: memref<8x8x32xf32, #tpu.memory_space<vmem>>, %arg7: memref<8x64xf32, #tpu.memory_space<vmem>>) attributes {dimension_semantics = [#tpu.dimension_semantics<parallel>, #tpu.dimension_semantics<arbitrary>], iteration_bounds = array<i64: 1, 1>, scalar_prefetch = 0 : i64, scratch_operands = 1 : i64, tpu.core_type = #tpu.core_type<tc>, window_params = [{transform_indices = @transform_0, window_bounds = array<i64: 8, 8, 32>}, {transform_indices = @transform_1, window_bounds = array<i64: 8, 8, 32>}, {pipeline_mode = #tpu.pipeline_mode<synchronous>, transform_indices = @transform_2, window_bounds = array<i64: 64, 32>}, {pipeline_mode = #tpu.pipeline_mode<synchronous>, transform_indices = @transform_3, window_bounds = array<i64: 64, 32>}, {transform_indices = @transform_4, window_bounds = array<i64: 8, 8, 32>}]} {
    %c0_i32 = arith.constant 0 : i32
    %0 = arith.cmpi eq, %arg1, %c0_i32 : i32
    %1 = arith.extui %0 : i1 to i32
    %c0_i32_0 = arith.constant 0 : i32
    %2 = arith.cmpi ne, %1, %c0_i32_0 : i32
    scf.if %2 {
      %cst_175 = arith.constant 0.000000e+00 : f32
      %147 = vector.broadcast %cst_175 : f32 to vector<8x64xf32>
      %c0_176 = arith.constant 0 : index
      %c0_177 = arith.constant 0 : index
      %148 = vector.load %arg7[%c0_176, %c0_177] : memref<8x64xf32, #tpu.memory_space<vmem>>, vector<8x64xf32>
      tpu.vector_store %arg7[%c0_176, %c0_177], %147 {strides = array<i32>} : memref<8x64xf32, #tpu.memory_space<vmem>>, vector<8x64xf32>,
    } else {
    }
    %c0 = arith.constant 0 : index
    %c0_1 = arith.constant 0 : index
    %c0_2 = arith.constant 0 : index
    %3 = vector.load %arg3[%c0, %c0_1, %c0_2] : memref<8x8x32xf32, #tpu.memory_space<vmem>>, vector<1x8x32xf32>
    %4 = vector.shape_cast %3 : vector<1x8x32xf32> to vector<8x32xf32>
    %c0_3 = arith.constant 0 : index
    %c0_4 = arith.constant 0 : index
    %5 = vector.load %arg7[%c0_3, %c0_4] : memref<8x64xf32, #tpu.memory_space<vmem>>, vector<8x64xf32>
    %c0_5 = arith.constant 0 : index
    %c0_6 = arith.constant 0 : index
    %6 = vector.load %arg4[%c0_5, %c0_6] : memref<64x32xf32, #tpu.memory_space<vmem>>, vector<64x32xf32>
    %cst = arith.constant dense<0.000000e+00> : vector<8x32xf32>
    %7 = tpu.matmul %5, %6, %cst {dimension_numbers = #tpu.dot_dimension_numbers<[1], [0], [0], [1], [0, 0, 1, 1], [], []>} : vector<8x64xf32>, vector<64x32xf32>, vector<8x32xf32> -> vector<8x32xf32>
    %8 = arith.addf %4, %7 : vector<8x32xf32>
    %c0_7 = arith.constant 0 : index
    %c32 = arith.constant 32 : index
    %9 = vector.load %arg7[%c0_7, %c32] : memref<8x64xf32, #tpu.memory_space<vmem>>, vector<8x32xf32>
    tpu.vector_store %arg7[%c0_7, %c32], %8 {strides = array<i32>} : memref<8x64xf32, #tpu.memory_space<vmem>>, vector<8x32xf32>,
    %c0_8 = arith.constant 0 : index
    %c0_9 = arith.constant 0 : index
    %c0_10 = arith.constant 0 : index
    %10 = vector.load %arg2[%c0_8, %c0_9, %c0_10] : memref<8x8x32xf32, #tpu.memory_space<vmem>>, vector<1x8x32xf32>
    %11 = vector.shape_cast %10 : vector<1x8x32xf32> to vector<8x32xf32>
    %c0_11 = arith.constant 0 : index
    %c0_12 = arith.constant 0 : index
    %12 = vector.load %arg7[%c0_11, %c0_12] : memref<8x64xf32, #tpu.memory_space<vmem>>, vector<8x64xf32>
    %c0_13 = arith.constant 0 : index
    %c0_14 = arith.constant 0 : index
    %13 = vector.load %arg5[%c0_13, %c0_14] : memref<64x32xf32, #tpu.memory_space<vmem>>, vector<64x32xf32>
    %cst_15 = arith.constant dense<0.000000e+00> : vector<8x32xf32>
    %14 = tpu.matmul %12, %13, %cst_15 {dimension_numbers = #tpu.dot_dimension_numbers<[1], [0], [0], [1], [0, 0, 1, 1], [], []>} : vector<8x64xf32>, vector<64x32xf32>, vector<8x32xf32> -> vector<8x32xf32>
    %15 = arith.addf %11, %14 : vector<8x32xf32>
    %16 = math.tanh %15 : vector<8x32xf32>
    %c0_16 = arith.constant 0 : index
    %c0_17 = arith.constant 0 : index
    %17 = vector.load %arg7[%c0_16, %c0_17] : memref<8x64xf32, #tpu.memory_space<vmem>>, vector<8x32xf32>
    tpu.vector_store %arg7[%c0_16, %c0_17], %16 {strides = array<i32>} : memref<8x64xf32, #tpu.memory_space<vmem>>, vector<8x32xf32>,
    %c0_18 = arith.constant 0 : index
    %c0_19 = arith.constant 0 : index
    %c0_20 = arith.constant 0 : index
    %18 = vector.load %arg6[%c0_18, %c0_19, %c0_20] : memref<8x8x32xf32, #tpu.memory_space<vmem>>, vector<1x8x32xf32>
    %19 = vector.shape_cast %18 : vector<1x8x32xf32> to vector<8x32xf32>
    %20 = vector.shape_cast %16 : vector<8x32xf32> to vector<1x8x32xf32>
    tpu.vector_store %arg6[%c0_18, %c0_19, %c0_20], %20 {strides = array<i32>} : memref<8x8x32xf32, #tpu.memory_space<vmem>>, vector<1x8x32xf32>,
    %c1 = arith.constant 1 : index
    %c0_21 = arith.constant 0 : index
    %c0_22 = arith.constant 0 : index
    %21 = vector.load %arg3[%c1, %c0_21, %c0_22] : memref<8x8x32xf32, #tpu.memory_space<vmem>>, vector<1x8x32xf32>
    %22 = vector.shape_cast %21 : vector<1x8x32xf32> to vector<8x32xf32>
    %c0_23 = arith.constant 0 : index
    %c0_24 = arith.constant 0 : index
    %23 = vector.load %arg7[%c0_23, %c0_24] : memref<8x64xf32, #tpu.memory_space<vmem>>, vector<8x64xf32>
    %c0_25 = arith.constant 0 : index
    %c0_26 = arith.constant 0 : index
    %24 = vector.load %arg4[%c0_25, %c0_26] : memref<64x32xf32, #tpu.memory_space<vmem>>, vector<64x32xf32>
    %cst_27 = arith.constant dense<0.000000e+00> : vector<8x32xf32>
    %25 = tpu.matmul %23, %24, %cst_27 {dimension_numbers = #tpu.dot_dimension_numbers<[1], [0], [0], [1], [0, 0, 1, 1], [], []>} : vector<8x64xf32>, vector<64x32xf32>, vector<8x32xf32> -> vector<8x32xf32>
    %26 = arith.addf %22, %25 : vector<8x32xf32>
    %c0_28 = arith.constant 0 : index
    %c32_29 = arith.constant 32 : index
    %27 = vector.load %arg7[%c0_28, %c32_29] : memref<8x64xf32, #tpu.memory_space<vmem>>, vector<8x32xf32>
    tpu.vector_store %arg7[%c0_28, %c32_29], %26 {strides = array<i32>} : memref<8x64xf32, #tpu.memory_space<vmem>>, vector<8x32xf32>,
    %c1_30 = arith.constant 1 : index
    %c0_31 = arith.constant 0 : index
    %c0_32 = arith.constant 0 : index
    %28 = vector.load %arg2[%c1_30, %c0_31, %c0_32] : memref<8x8x32xf32, #tpu.memory_space<vmem>>, vector<1x8x32xf32>
    %29 = vector.shape_cast %28 : vector<1x8x32xf32> to vector<8x32xf32>
    %c0_33 = arith.constant 0 : index
    %c0_34 = arith.constant 0 : index
    %30 = vector.load %arg7[%c0_33, %c0_34] : memref<8x64xf32, #tpu.memory_space<vmem>>, vector<8x64xf32>
    %c0_35 = arith.constant 0 : index
    %c0_36 = arith.constant 0 : index
    %31 = vector.load %arg5[%c0_35, %c0_36] : memref<64x32xf32, #tpu.memory_space<vmem>>, vector<64x32xf32>
    %cst_37 = arith.constant dense<0.000000e+00> : vector<8x32xf32>
    %32 = tpu.matmul %30, %31, %cst_37 {dimension_numbers = #tpu.dot_dimension_numbers<[1], [0], [0], [1], [0, 0, 1, 1], [], []>} : vector<8x64xf32>, vector<64x32xf32>, vector<8x32xf32> -> vector<8x32xf32>
    %33 = arith.addf %29, %32 : vector<8x32xf32>
    %34 = math.tanh %33 : vector<8x32xf32>
    %c0_38 = arith.constant 0 : index
    %c0_39 = arith.constant 0 : index
    %35 = vector.load %arg7[%c0_38, %c0_39] : memref<8x64xf32, #tpu.memory_space<vmem>>, vector<8x32xf32>
    tpu.vector_store %arg7[%c0_38, %c0_39], %34 {strides = array<i32>} : memref<8x64xf32, #tpu.memory_space<vmem>>, vector<8x32xf32>,
    %c1_40 = arith.constant 1 : index
    %c0_41 = arith.constant 0 : index
    %c0_42 = arith.constant 0 : index
    %36 = vector.load %arg6[%c1_40, %c0_41, %c0_42] : memref<8x8x32xf32, #tpu.memory_space<vmem>>, vector<1x8x32xf32>
    %37 = vector.shape_cast %36 : vector<1x8x32xf32> to vector<8x32xf32>
    %38 = vector.shape_cast %34 : vector<8x32xf32> to vector<1x8x32xf32>
    tpu.vector_store %arg6[%c1_40, %c0_41, %c0_42], %38 {strides = array<i32>} : memref<8x8x32xf32, #tpu.memory_space<vmem>>, vector<1x8x32xf32>,
    %c2 = arith.constant 2 : index
    %c0_43 = arith.constant 0 : index
    %c0_44 = arith.constant 0 : index
    %39 = vector.load %arg3[%c2, %c0_43, %c0_44] : memref<8x8x32xf32, #tpu.memory_space<vmem>>, vector<1x8x32xf32>
    %40 = vector.shape_cast %39 : vector<1x8x32xf32> to vector<8x32xf32>
    %c0_45 = arith.constant 0 : index
    %c0_46 = arith.constant 0 : index
    %41 = vector.load %arg7[%c0_45, %c0_46] : memref<8x64xf32, #tpu.memory_space<vmem>>, vector<8x64xf32>
    %c0_47 = arith.constant 0 : index
    %c0_48 = arith.constant 0 : index
    %42 = vector.load %arg4[%c0_47, %c0_48] : memref<64x32xf32, #tpu.memory_space<vmem>>, vector<64x32xf32>
    %cst_49 = arith.constant dense<0.000000e+00> : vector<8x32xf32>
    %43 = tpu.matmul %41, %42, %cst_49 {dimension_numbers = #tpu.dot_dimension_numbers<[1], [0], [0], [1], [0, 0, 1, 1], [], []>} : vector<8x64xf32>, vector<64x32xf32>, vector<8x32xf32> -> vector<8x32xf32>
    %44 = arith.addf %40, %43 : vector<8x32xf32>
    %c0_50 = arith.constant 0 : index
    %c32_51 = arith.constant 32 : index
    %45 = vector.load %arg7[%c0_50, %c32_51] : memref<8x64xf32, #tpu.memory_space<vmem>>, vector<8x32xf32>
    tpu.vector_store %arg7[%c0_50, %c32_51], %44 {strides = array<i32>} : memref<8x64xf32, #tpu.memory_space<vmem>>, vector<8x32xf32>,
    %c2_52 = arith.constant 2 : index
    %c0_53 = arith.constant 0 : index
    %c0_54 = arith.constant 0 : index
    %46 = vector.load %arg2[%c2_52, %c0_53, %c0_54] : memref<8x8x32xf32, #tpu.memory_space<vmem>>, vector<1x8x32xf32>
    %47 = vector.shape_cast %46 : vector<1x8x32xf32> to vector<8x32xf32>
    %c0_55 = arith.constant 0 : index
    %c0_56 = arith.constant 0 : index
    %48 = vector.load %arg7[%c0_55, %c0_56] : memref<8x64xf32, #tpu.memory_space<vmem>>, vector<8x64xf32>
    %c0_57 = arith.constant 0 : index
    %c0_58 = arith.constant 0 : index
    %49 = vector.load %arg5[%c0_57, %c0_58] : memref<64x32xf32, #tpu.memory_space<vmem>>, vector<64x32xf32>
    %cst_59 = arith.constant dense<0.000000e+00> : vector<8x32xf32>
    %50 = tpu.matmul %48, %49, %cst_59 {dimension_numbers = #tpu.dot_dimension_numbers<[1], [0], [0], [1], [0, 0, 1, 1], [], []>} : vector<8x64xf32>, vector<64x32xf32>, vector<8x32xf32> -> vector<8x32xf32>
    %51 = arith.addf %47, %50 : vector<8x32xf32>
    %52 = math.tanh %51 : vector<8x32xf32>
    %c0_60 = arith.constant 0 : index
    %c0_61 = arith.constant 0 : index
    %53 = vector.load %arg7[%c0_60, %c0_61] : memref<8x64xf32, #tpu.memory_space<vmem>>, vector<8x32xf32>
    tpu.vector_store %arg7[%c0_60, %c0_61], %52 {strides = array<i32>} : memref<8x64xf32, #tpu.memory_space<vmem>>, vector<8x32xf32>,
    %c2_62 = arith.constant 2 : index
    %c0_63 = arith.constant 0 : index
    %c0_64 = arith.constant 0 : index
    %54 = vector.load %arg6[%c2_62, %c0_63, %c0_64] : memref<8x8x32xf32, #tpu.memory_space<vmem>>, vector<1x8x32xf32>
    %55 = vector.shape_cast %54 : vector<1x8x32xf32> to vector<8x32xf32>
    %56 = vector.shape_cast %52 : vector<8x32xf32> to vector<1x8x32xf32>
    tpu.vector_store %arg6[%c2_62, %c0_63, %c0_64], %56 {strides = array<i32>} : memref<8x8x32xf32, #tpu.memory_space<vmem>>, vector<1x8x32xf32>,
    %c3 = arith.constant 3 : index
    %c0_65 = arith.constant 0 : index
    %c0_66 = arith.constant 0 : index
    %57 = vector.load %arg3[%c3, %c0_65, %c0_66] : memref<8x8x32xf32, #tpu.memory_space<vmem>>, vector<1x8x32xf32>
    %58 = vector.shape_cast %57 : vector<1x8x32xf32> to vector<8x32xf32>
    %c0_67 = arith.constant 0 : index
    %c0_68 = arith.constant 0 : index
    %59 = vector.load %arg7[%c0_67, %c0_68] : memref<8x64xf32, #tpu.memory_space<vmem>>, vector<8x64xf32>
    %c0_69 = arith.constant 0 : index
    %c0_70 = arith.constant 0 : index
    %60 = vector.load %arg4[%c0_69, %c0_70] : memref<64x32xf32, #tpu.memory_space<vmem>>, vector<64x32xf32>
    %cst_71 = arith.constant dense<0.000000e+00> : vector<8x32xf32>
    %61 = tpu.matmul %59, %60, %cst_71 {dimension_numbers = #tpu.dot_dimension_numbers<[1], [0], [0], [1], [0, 0, 1, 1], [], []>} : vector<8x64xf32>, vector<64x32xf32>, vector<8x32xf32> -> vector<8x32xf32>
    %62 = arith.addf %58, %61 : vector<8x32xf32>
    %c0_72 = arith.constant 0 : index
    %c32_73 = arith.constant 32 : index
    %63 = vector.load %arg7[%c0_72, %c32_73] : memref<8x64xf32, #tpu.memory_space<vmem>>, vector<8x32xf32>
    tpu.vector_store %arg7[%c0_72, %c32_73], %62 {strides = array<i32>} : memref<8x64xf32, #tpu.memory_space<vmem>>, vector<8x32xf32>,
    %c3_74 = arith.constant 3 : index
    %c0_75 = arith.constant 0 : index
    %c0_76 = arith.constant 0 : index
    %64 = vector.load %arg2[%c3_74, %c0_75, %c0_76] : memref<8x8x32xf32, #tpu.memory_space<vmem>>, vector<1x8x32xf32>
    %65 = vector.shape_cast %64 : vector<1x8x32xf32> to vector<8x32xf32>
    %c0_77 = arith.constant 0 : index
    %c0_78 = arith.constant 0 : index
    %66 = vector.load %arg7[%c0_77, %c0_78] : memref<8x64xf32, #tpu.memory_space<vmem>>, vector<8x64xf32>
    %c0_79 = arith.constant 0 : index
    %c0_80 = arith.constant 0 : index
    %67 = vector.load %arg5[%c0_79, %c0_80] : memref<64x32xf32, #tpu.memory_space<vmem>>, vector<64x32xf32>
    %cst_81 = arith.constant dense<0.000000e+00> : vector<8x32xf32>
    %68 = tpu.matmul %66, %67, %cst_81 {dimension_numbers = #tpu.dot_dimension_numbers<[1], [0], [0], [1], [0, 0, 1, 1], [], []>} : vector<8x64xf32>, vector<64x32xf32>, vector<8x32xf32> -> vector<8x32xf32>
    %69 = arith.addf %65, %68 : vector<8x32xf32>
    %70 = math.tanh %69 : vector<8x32xf32>
    %c0_82 = arith.constant 0 : index
    %c0_83 = arith.constant 0 : index
    %71 = vector.load %arg7[%c0_82, %c0_83] : memref<8x64xf32, #tpu.memory_space<vmem>>, vector<8x32xf32>
    tpu.vector_store %arg7[%c0_82, %c0_83], %70 {strides = array<i32>} : memref<8x64xf32, #tpu.memory_space<vmem>>, vector<8x32xf32>,
    %c3_84 = arith.constant 3 : index
    %c0_85 = arith.constant 0 : index
    %c0_86 = arith.constant 0 : index
    %72 = vector.load %arg6[%c3_84, %c0_85, %c0_86] : memref<8x8x32xf32, #tpu.memory_space<vmem>>, vector<1x8x32xf32>
    %73 = vector.shape_cast %72 : vector<1x8x32xf32> to vector<8x32xf32>
    %74 = vector.shape_cast %70 : vector<8x32xf32> to vector<1x8x32xf32>
    tpu.vector_store %arg6[%c3_84, %c0_85, %c0_86], %74 {strides = array<i32>} : memref<8x8x32xf32, #tpu.memory_space<vmem>>, vector<1x8x32xf32>,
    %c4 = arith.constant 4 : index
    %c0_87 = arith.constant 0 : index
    %c0_88 = arith.constant 0 : index
    %75 = vector.load %arg3[%c4, %c0_87, %c0_88] : memref<8x8x32xf32, #tpu.memory_space<vmem>>, vector<1x8x32xf32>
    %76 = vector.shape_cast %75 : vector<1x8x32xf32> to vector<8x32xf32>
    %c0_89 = arith.constant 0 : index
    %c0_90 = arith.constant 0 : index
    %77 = vector.load %arg7[%c0_89, %c0_90] : memref<8x64xf32, #tpu.memory_space<vmem>>, vector<8x64xf32>
    %c0_91 = arith.constant 0 : index
    %c0_92 = arith.constant 0 : index
    %78 = vector.load %arg4[%c0_91, %c0_92] : memref<64x32xf32, #tpu.memory_space<vmem>>, vector<64x32xf32>
    %cst_93 = arith.constant dense<0.000000e+00> : vector<8x32xf32>
    %79 = tpu.matmul %77, %78, %cst_93 {dimension_numbers = #tpu.dot_dimension_numbers<[1], [0], [0], [1], [0, 0, 1, 1], [], []>} : vector<8x64xf32>, vector<64x32xf32>, vector<8x32xf32> -> vector<8x32xf32>
    %80 = arith.addf %76, %79 : vector<8x32xf32>
    %c0_94 = arith.constant 0 : index
    %c32_95 = arith.constant 32 : index
    %81 = vector.load %arg7[%c0_94, %c32_95] : memref<8x64xf32, #tpu.memory_space<vmem>>, vector<8x32xf32>
    tpu.vector_store %arg7[%c0_94, %c32_95], %80 {strides = array<i32>} : memref<8x64xf32, #tpu.memory_space<vmem>>, vector<8x32xf32>,
    %c4_96 = arith.constant 4 : index
    %c0_97 = arith.constant 0 : index
    %c0_98 = arith.constant 0 : index
    %82 = vector.load %arg2[%c4_96, %c0_97, %c0_98] : memref<8x8x32xf32, #tpu.memory_space<vmem>>, vector<1x8x32xf32>
    %83 = vector.shape_cast %82 : vector<1x8x32xf32> to vector<8x32xf32>
    %c0_99 = arith.constant 0 : index
    %c0_100 = arith.constant 0 : index
    %84 = vector.load %arg7[%c0_99, %c0_100] : memref<8x64xf32, #tpu.memory_space<vmem>>, vector<8x64xf32>
    %c0_101 = arith.constant 0 : index
    %c0_102 = arith.constant 0 : index
    %85 = vector.load %arg5[%c0_101, %c0_102] : memref<64x32xf32, #tpu.memory_space<vmem>>, vector<64x32xf32>
    %cst_103 = arith.constant dense<0.000000e+00> : vector<8x32xf32>
    %86 = tpu.matmul %84, %85, %cst_103 {dimension_numbers = #tpu.dot_dimension_numbers<[1], [0], [0], [1], [0, 0, 1, 1], [], []>} : vector<8x64xf32>, vector<64x32xf32>, vector<8x32xf32> -> vector<8x32xf32>
    %87 = arith.addf %83, %86 : vector<8x32xf32>
    %88 = math.tanh %87 : vector<8x32xf32>
    %c0_104 = arith.constant 0 : index
    %c0_105 = arith.constant 0 : index
    %89 = vector.load %arg7[%c0_104, %c0_105] : memref<8x64xf32, #tpu.memory_space<vmem>>, vector<8x32xf32>
    tpu.vector_store %arg7[%c0_104, %c0_105], %88 {strides = array<i32>} : memref<8x64xf32, #tpu.memory_space<vmem>>, vector<8x32xf32>,
    %c4_106 = arith.constant 4 : index
    %c0_107 = arith.constant 0 : index
    %c0_108 = arith.constant 0 : index
    %90 = vector.load %arg6[%c4_106, %c0_107, %c0_108] : memref<8x8x32xf32, #tpu.memory_space<vmem>>, vector<1x8x32xf32>
    %91 = vector.shape_cast %90 : vector<1x8x32xf32> to vector<8x32xf32>
    %92 = vector.shape_cast %88 : vector<8x32xf32> to vector<1x8x32xf32>
    tpu.vector_store %arg6[%c4_106, %c0_107, %c0_108], %92 {strides = array<i32>} : memref<8x8x32xf32, #tpu.memory_space<vmem>>, vector<1x8x32xf32>,
    %c5 = arith.constant 5 : index
    %c0_109 = arith.constant 0 : index
    %c0_110 = arith.constant 0 : index
    %93 = vector.load %arg3[%c5, %c0_109, %c0_110] : memref<8x8x32xf32, #tpu.memory_space<vmem>>, vector<1x8x32xf32>
    %94 = vector.shape_cast %93 : vector<1x8x32xf32> to vector<8x32xf32>
    %c0_111 = arith.constant 0 : index
    %c0_112 = arith.constant 0 : index
    %95 = vector.load %arg7[%c0_111, %c0_112] : memref<8x64xf32, #tpu.memory_space<vmem>>, vector<8x64xf32>
    %c0_113 = arith.constant 0 : index
    %c0_114 = arith.constant 0 : index
    %96 = vector.load %arg4[%c0_113, %c0_114] : memref<64x32xf32, #tpu.memory_space<vmem>>, vector<64x32xf32>
    %cst_115 = arith.constant dense<0.000000e+00> : vector<8x32xf32>
    %97 = tpu.matmul %95, %96, %cst_115 {dimension_numbers = #tpu.dot_dimension_numbers<[1], [0], [0], [1], [0, 0, 1, 1], [], []>} : vector<8x64xf32>, vector<64x32xf32>, vector<8x32xf32> -> vector<8x32xf32>
    %98 = arith.addf %94, %97 : vector<8x32xf32>
    %c0_116 = arith.constant 0 : index
    %c32_117 = arith.constant 32 : index
    %99 = vector.load %arg7[%c0_116, %c32_117] : memref<8x64xf32, #tpu.memory_space<vmem>>, vector<8x32xf32>
    tpu.vector_store %arg7[%c0_116, %c32_117], %98 {strides = array<i32>} : memref<8x64xf32, #tpu.memory_space<vmem>>, vector<8x32xf32>,
    %c5_118 = arith.constant 5 : index
    %c0_119 = arith.constant 0 : index
    %c0_120 = arith.constant 0 : index
    %100 = vector.load %arg2[%c5_118, %c0_119, %c0_120] : memref<8x8x32xf32, #tpu.memory_space<vmem>>, vector<1x8x32xf32>
    %101 = vector.shape_cast %100 : vector<1x8x32xf32> to vector<8x32xf32>
    %c0_121 = arith.constant 0 : index
    %c0_122 = arith.constant 0 : index
    %102 = vector.load %arg7[%c0_121, %c0_122] : memref<8x64xf32, #tpu.memory_space<vmem>>, vector<8x64xf32>
    %c0_123 = arith.constant 0 : index
    %c0_124 = arith.constant 0 : index
    %103 = vector.load %arg5[%c0_123, %c0_124] : memref<64x32xf32, #tpu.memory_space<vmem>>, vector<64x32xf32>
    %cst_125 = arith.constant dense<0.000000e+00> : vector<8x32xf32>
    %104 = tpu.matmul %102, %103, %cst_125 {dimension_numbers = #tpu.dot_dimension_numbers<[1], [0], [0], [1], [0, 0, 1, 1], [], []>} : vector<8x64xf32>, vector<64x32xf32>, vector<8x32xf32> -> vector<8x32xf32>
    %105 = arith.addf %101, %104 : vector<8x32xf32>
    %106 = math.tanh %105 : vector<8x32xf32>
    %c0_126 = arith.constant 0 : index
    %c0_127 = arith.constant 0 : index
    %107 = vector.load %arg7[%c0_126, %c0_127] : memref<8x64xf32, #tpu.memory_space<vmem>>, vector<8x32xf32>
    tpu.vector_store %arg7[%c0_126, %c0_127], %106 {strides = array<i32>} : memref<8x64xf32, #tpu.memory_space<vmem>>, vector<8x32xf32>,
    %c5_128 = arith.constant 5 : index
    %c0_129 = arith.constant 0 : index
    %c0_130 = arith.constant 0 : index
    %108 = vector.load %arg6[%c5_128, %c0_129, %c0_130] : memref<8x8x32xf32, #tpu.memory_space<vmem>>, vector<1x8x32xf32>
    %109 = vector.shape_cast %108 : vector<1x8x32xf32> to vector<8x32xf32>
    %110 = vector.shape_cast %106 : vector<8x32xf32> to vector<1x8x32xf32>
    tpu.vector_store %arg6[%c5_128, %c0_129, %c0_130], %110 {strides = array<i32>} : memref<8x8x32xf32, #tpu.memory_space<vmem>>, vector<1x8x32xf32>,
    %c6 = arith.constant 6 : index
    %c0_131 = arith.constant 0 : index
    %c0_132 = arith.constant 0 : index
    %111 = vector.load %arg3[%c6, %c0_131, %c0_132] : memref<8x8x32xf32, #tpu.memory_space<vmem>>, vector<1x8x32xf32>
    %112 = vector.shape_cast %111 : vector<1x8x32xf32> to vector<8x32xf32>
    %c0_133 = arith.constant 0 : index
    %c0_134 = arith.constant 0 : index
    %113 = vector.load %arg7[%c0_133, %c0_134] : memref<8x64xf32, #tpu.memory_space<vmem>>, vector<8x64xf32>
    %c0_135 = arith.constant 0 : index
    %c0_136 = arith.constant 0 : index
    %114 = vector.load %arg4[%c0_135, %c0_136] : memref<64x32xf32, #tpu.memory_space<vmem>>, vector<64x32xf32>
    %cst_137 = arith.constant dense<0.000000e+00> : vector<8x32xf32>
    %115 = tpu.matmul %113, %114, %cst_137 {dimension_numbers = #tpu.dot_dimension_numbers<[1], [0], [0], [1], [0, 0, 1, 1], [], []>} : vector<8x64xf32>, vector<64x32xf32>, vector<8x32xf32> -> vector<8x32xf32>
    %116 = arith.addf %112, %115 : vector<8x32xf32>
    %c0_138 = arith.constant 0 : index
    %c32_139 = arith.constant 32 : index
    %117 = vector.load %arg7[%c0_138, %c32_139] : memref<8x64xf32, #tpu.memory_space<vmem>>, vector<8x32xf32>
    tpu.vector_store %arg7[%c0_138, %c32_139], %116 {strides = array<i32>} : memref<8x64xf32, #tpu.memory_space<vmem>>, vector<8x32xf32>,
    %c6_140 = arith.constant 6 : index
    %c0_141 = arith.constant 0 : index
    %c0_142 = arith.constant 0 : index
    %118 = vector.load %arg2[%c6_140, %c0_141, %c0_142] : memref<8x8x32xf32, #tpu.memory_space<vmem>>, vector<1x8x32xf32>
    %119 = vector.shape_cast %118 : vector<1x8x32xf32> to vector<8x32xf32>
    %c0_143 = arith.constant 0 : index
    %c0_144 = arith.constant 0 : index
    %120 = vector.load %arg7[%c0_143, %c0_144] : memref<8x64xf32, #tpu.memory_space<vmem>>, vector<8x64xf32>
    %c0_145 = arith.constant 0 : index
    %c0_146 = arith.constant 0 : index
    %121 = vector.load %arg5[%c0_145, %c0_146] : memref<64x32xf32, #tpu.memory_space<vmem>>, vector<64x32xf32>
    %cst_147 = arith.constant dense<0.000000e+00> : vector<8x32xf32>
    %122 = tpu.matmul %120, %121, %cst_147 {dimension_numbers = #tpu.dot_dimension_numbers<[1], [0], [0], [1], [0, 0, 1, 1], [], []>} : vector<8x64xf32>, vector<64x32xf32>, vector<8x32xf32> -> vector<8x32xf32>
    %123 = arith.addf %119, %122 : vector<8x32xf32>
    %124 = math.tanh %123 : vector<8x32xf32>
    %c0_148 = arith.constant 0 : index
    %c0_149 = arith.constant 0 : index
    %125 = vector.load %arg7[%c0_148, %c0_149] : memref<8x64xf32, #tpu.memory_space<vmem>>, vector<8x32xf32>
    tpu.vector_store %arg7[%c0_148, %c0_149], %124 {strides = array<i32>} : memref<8x64xf32, #tpu.memory_space<vmem>>, vector<8x32xf32>,
    %c6_150 = arith.constant 6 : index
    %c0_151 = arith.constant 0 : index
    %c0_152 = arith.constant 0 : index
    %126 = vector.load %arg6[%c6_150, %c0_151, %c0_152] : memref<8x8x32xf32, #tpu.memory_space<vmem>>, vector<1x8x32xf32>
    %127 = vector.shape_cast %126 : vector<1x8x32xf32> to vector<8x32xf32>
    %128 = vector.shape_cast %124 : vector<8x32xf32> to vector<1x8x32xf32>
    tpu.vector_store %arg6[%c6_150, %c0_151, %c0_152], %128 {strides = array<i32>} : memref<8x8x32xf32, #tpu.memory_space<vmem>>, vector<1x8x32xf32>,
    %c7 = arith.constant 7 : index
    %c0_153 = arith.constant 0 : index
    %c0_154 = arith.constant 0 : index
    %129 = vector.load %arg3[%c7, %c0_153, %c0_154] : memref<8x8x32xf32, #tpu.memory_space<vmem>>, vector<1x8x32xf32>
    %130 = vector.shape_cast %129 : vector<1x8x32xf32> to vector<8x32xf32>
    %c0_155 = arith.constant 0 : index
    %c0_156 = arith.constant 0 : index
    %131 = vector.load %arg7[%c0_155, %c0_156] : memref<8x64xf32, #tpu.memory_space<vmem>>, vector<8x64xf32>
    %c0_157 = arith.constant 0 : index
    %c0_158 = arith.constant 0 : index
    %132 = vector.load %arg4[%c0_157, %c0_158] : memref<64x32xf32, #tpu.memory_space<vmem>>, vector<64x32xf32>
    %cst_159 = arith.constant dense<0.000000e+00> : vector<8x32xf32>
    %133 = tpu.matmul %131, %132, %cst_159 {dimension_numbers = #tpu.dot_dimension_numbers<[1], [0], [0], [1], [0, 0, 1, 1], [], []>} : vector<8x64xf32>, vector<64x32xf32>, vector<8x32xf32> -> vector<8x32xf32>
    %134 = arith.addf %130, %133 : vector<8x32xf32>
    %c0_160 = arith.constant 0 : index
    %c32_161 = arith.constant 32 : index
    %135 = vector.load %arg7[%c0_160, %c32_161] : memref<8x64xf32, #tpu.memory_space<vmem>>, vector<8x32xf32>
    tpu.vector_store %arg7[%c0_160, %c32_161], %134 {strides = array<i32>} : memref<8x64xf32, #tpu.memory_space<vmem>>, vector<8x32xf32>,
    %c7_162 = arith.constant 7 : index
    %c0_163 = arith.constant 0 : index
    %c0_164 = arith.constant 0 : index
    %136 = vector.load %arg2[%c7_162, %c0_163, %c0_164] : memref<8x8x32xf32, #tpu.memory_space<vmem>>, vector<1x8x32xf32>
    %137 = vector.shape_cast %136 : vector<1x8x32xf32> to vector<8x32xf32>
    %c0_165 = arith.constant 0 : index
    %c0_166 = arith.constant 0 : index
    %138 = vector.load %arg7[%c0_165, %c0_166] : memref<8x64xf32, #tpu.memory_space<vmem>>, vector<8x64xf32>
    %c0_167 = arith.constant 0 : index
    %c0_168 = arith.constant 0 : index
    %139 = vector.load %arg5[%c0_167, %c0_168] : memref<64x32xf32, #tpu.memory_space<vmem>>, vector<64x32xf32>
    %cst_169 = arith.constant dense<0.000000e+00> : vector<8x32xf32>
    %140 = tpu.matmul %138, %139, %cst_169 {dimension_numbers = #tpu.dot_dimension_numbers<[1], [0], [0], [1], [0, 0, 1, 1], [], []>} : vector<8x64xf32>, vector<64x32xf32>, vector<8x32xf32> -> vector<8x32xf32>
    %141 = arith.addf %137, %140 : vector<8x32xf32>
    %142 = math.tanh %141 : vector<8x32xf32>
    %c0_170 = arith.constant 0 : index
    %c0_171 = arith.constant 0 : index
    %143 = vector.load %arg7[%c0_170, %c0_171] : memref<8x64xf32, #tpu.memory_space<vmem>>, vector<8x32xf32>
    tpu.vector_store %arg7[%c0_170, %c0_171], %142 {strides = array<i32>} : memref<8x64xf32, #tpu.memory_space<vmem>>, vector<8x32xf32>,
    %c7_172 = arith.constant 7 : index
    %c0_173 = arith.constant 0 : index
    %c0_174 = arith.constant 0 : index
    %144 = vector.load %arg6[%c7_172, %c0_173, %c0_174] : memref<8x8x32xf32, #tpu.memory_space<vmem>>, vector<1x8x32xf32>
    %145 = vector.shape_cast %144 : vector<1x8x32xf32> to vector<8x32xf32>
    %146 = vector.shape_cast %142 : vector<8x32xf32> to vector<1x8x32xf32>
    tpu.vector_store %arg6[%c7_172, %c0_173, %c0_174], %146 {strides = array<i32>} : memref<8x8x32xf32, #tpu.memory_space<vmem>>, vector<1x8x32xf32>,
    return
  }
  func.func @transform_0(%arg0: i32, %arg1: i32) -> (i32, i32, i32) {
    %c0_i32 = arith.constant 0 : i32
    %c0_i32_0 = arith.constant 0 : i32
    return %arg1, %arg0, %c0_i32 : i32, i32, i32
  }
  func.func @transform_1(%arg0: i32, %arg1: i32) -> (i32, i32, i32) {
    %c0_i32 = arith.constant 0 : i32
    %c0_i32_0 = arith.constant 0 : i32
    return %arg1, %arg0, %c0_i32 : i32, i32, i32
  }
  func.func @transform_2(%arg0: i32, %arg1: i32) -> (i32, i32) {
    %c0_i32 = arith.constant 0 : i32
    %c0_i32_0 = arith.constant 0 : i32
    %c0_i32_1 = arith.constant 0 : i32
    return %c0_i32, %c0_i32_0 : i32, i32
  }
  func.func @transform_3(%arg0: i32, %arg1: i32) -> (i32, i32) {
    %c0_i32 = arith.constant 0 : i32
    %c0_i32_0 = arith.constant 0 : i32
    %c0_i32_1 = arith.constant 0 : i32
    return %c0_i32, %c0_i32_0 : i32, i32
  }
  func.func @transform_4(%arg0: i32, %arg1: i32) -> (i32, i32, i32) {
    %c0_i32 = arith.constant 0 : i32
    %c0_i32_0 = arith.constant 0 : i32
    return %arg1, %arg0, %c0_i32 : i32, i32, i32
  }
}

</mosaic_0001>

<bundles_post_ra>
// kernel: tpu_custom_call.1
= control target key start
LH: loop header
LB: loop body
LE: loop exit
PB: predicated region body
PF: predicated region fallthrough
CT: control target
= control target key end

     0   :  { %vm22_vm0 = vcmask 523264   ;;  %v751_v2 = vmov 0.0   ;;  %s1089_s0 = inlined_call_operand.vmem [shape: f32[8,8,32], index: 0, kind: input, shape index: {}]   ;;  %s1090_s1 = inlined_call_operand.vmem [shape: f32[8,8,32], index: 1, kind: input, shape index: {}]   ;;  %s1091_s2 = inlined_call_operand.vmem [shape: f32[64,32], index: 2, kind: input, shape index: {}]   ;;  %s1092_s3 = inlined_call_operand.vmem [shape: f32[64,32], index: 3, kind: input, shape index: {}]   ;;  %s1093_s4 = inlined_call_operand.hbm [shape: f32[8,8,32], index: 4, kind: output, shape index: {}]  }
   0x1   :  { %v784_v0 = vld [vmem:[%s1091_s2 + $0x38] sm:$0xff]  ;;  %v789_v1 = vld [vmem:[%s1091_s2 + $0x30] sm:$0xff]  ;;  %23 = vst.msk [vmem:[#allocation2] sm:$0xff] %vm22_vm0, %v751_v2  ;;  %v797_v3 = vld [vmem:[%s1091_s2 + $0x28] sm:$0xff] }
   0x2   :  { %46 = vmatpush.msra.mxu0 %v784_v0  ;;  %125 = vmatpush.msra.mxu2 %v784_v0 }
   0x4   :  { %47 = vmatpush.msra.mxu0 %v789_v1  ;;  %126 = vmatpush.msra.mxu2 %v789_v1 }
   0x5   :  { %9 = vsyncpa [#allocation4], 0  ;;  %v804_v4 = vld [vmem:[%s1091_s2 + $0x20] sm:$0xff]  ;;  %v811_v5 = vld [vmem:[%s1091_s2 + $0x18] sm:$0xff]  ;;  %s752_s14 = smov 32   ;;  %vm63_vm1 = vcmask 523520  }
   0x6   :  { %48 = vmatpush.msra.mxu0 %v797_v3  ;;  %127 = vmatpush.msra.mxu2 %v797_v3  ;;  %v818_v6 = vld [vmem:[%s1091_s2 + $0x10] sm:$0xff]  ;;  %v825_v7 = vld [vmem:[%s1091_s2 + $0x8] sm:$0xff]  ;;  %v832_v8 = vld [vmem:[%s1091_s2] sm:$0xff]  ;;  %vm100_vm2 = vcmask 261120   ;;  %s753_s25 = smov [#allocation3]   ;;  %s662_s28 = sshll.u32 %s1093_s4, 4  ;;  %s663_s28 = int_to_ptr.hbm [resolvable:$true] %s662_s28 }
   0x7   :  { %v866_v10 = vld [vmem:[%s1092_s3 + $0x38] sm:$0xff]  ;;  %v871_v11 = vld [vmem:[%s1092_s3 + $0x30] sm:$0xff]  ;;  %v878_v12 = vld [vmem:[%s1092_s3 + $0x28] sm:$0xff]  ;;  %s660_s26 = sshll.u32 %s753_s25, 4  ;;  %s755_s29 = smov 8   ;;  %s661_s26 = int_to_ptr.vmem [resolvable:$true] %s660_s26 }
   0x8   :  { %49 = vmatpush.msra.mxu0 %v804_v4  ;;  %128 = vmatpush.msra.mxu2 %v804_v4  ;;  %v25_v9 = vld [vmem:[#allocation2] sm:$0xff]  ;;  %v898_v17 = vld [vmem:[%s1092_s3 + $0x18] sm:$0xff]  ;;  %v903_v18 = vld [vmem:[%s1092_s3 + $0x10] sm:$0xff] }
   0x9   :  { %86 = vmatpush.msra.mxu1 %v866_v10  ;;  %165 = vmatpush.msra.mxu3 %v866_v10  ;;  %v885_v13 = vld [vmem:[%s1092_s3 + $0x20] sm:$0xff]  ;;  %v910_v19 = vld [vmem:[%s1092_s3 + $0x8] sm:$0xff]  ;;  %v680_v38 = vld [vmem:[%s1090_s1 + $0x10] sm:$0xff] }
   0xa   :  { %50 = vmatpush.msra.mxu0 %v811_v5  ;;  %129 = vmatpush.msra.mxu2 %v811_v5  ;;  %v24_v14 = vld [vmem:[%s1090_s1] sm:$0xff]  ;;  %v676_v28 = vld [vmem:[%s1090_s1 + $0x8] sm:$0xff]  ;;  %v682_v43 = vld [vmem:[%s1089_s0 + $0x10] sm:$0xff] }
   0xb   :  { %87 = vmatpush.msra.mxu1 %v871_v11  ;;  %166 = vmatpush.msra.mxu3 %v871_v11  ;;  %v917_v20 = vld [vmem:[%s1092_s3] sm:$0xff]  ;;  %v678_v33 = vld [vmem:[%s1089_s0 + $0x8] sm:$0xff]  ;;  %v684_v48 = vld [vmem:[%s1090_s1 + $0x18] sm:$0xff] }
   0xc   :  { %51 = vmatpush.msra.mxu0 %v818_v6  ;;  %130 = vmatpush.msra.mxu2 %v818_v6  ;;  %v65_v23 = vld [vmem:[%s1089_s0] sm:$0xff]  ;;  %v686_v53 = vld [vmem:[%s1089_s0 + $0x18] sm:$0xff] }
   0xd   :  { %88 = vmatpush.msra.mxu1 %v878_v12  ;;  %167 = vmatpush.msra.mxu3 %v878_v12  ;;  %v688_v58 = vld [vmem:[%s1090_s1 + $0x20] sm:$0xff] }
   0xe   :  { %52 = vmatpush.msra.mxu0 %v825_v7  ;;  %131 = vmatpush.msra.mxu2 %v825_v7  ;;  %v690_v63 = vld [vmem:[%s1089_s0 + $0x20] sm:$0xff] }
   0xf   :  { %89 = vmatpush.msra.mxu1 %v885_v13  ;;  %168 = vmatpush.msra.mxu3 %v885_v13 }
  0x10   :  { %53 = vmatpush.msra.mxu0 %v832_v8  ;;  %132 = vmatpush.msra.mxu2 %v832_v8 }
  0x11   :  { %674 = vmatmul.msk.f32.vlgmr.msra.gmra.mxu0 %vm22_vm0, %v25_v9  ;;  %90 = vmatpush.msra.mxu1 %v898_v17  ;;  %v694_v9 = vld [vmem:[%s1089_s0 + $0x28] sm:$0xff] }
  0x12   :  { %283 = vmatpush.msrb.mxu2 %v784_v0  ;;  %204 = vmatpush.msrb.mxu0 %v784_v0 }
  0x13   :  { %169 = vmatpush.msra.mxu3 %v898_v17  ;;  %91 = vmatpush.msra.mxu1 %v903_v18 }
  0x14   :  { %284 = vmatpush.msrb.mxu2 %v789_v1  ;;  %205 = vmatpush.msrb.mxu0 %v789_v1 }
  0x15   :  { %170 = vmatpush.msra.mxu3 %v903_v18  ;;  %92 = vmatpush.msra.mxu1 %v910_v19 }
  0x16   :  { %285 = vmatpush.msrb.mxu2 %v797_v3  ;;  %206 = vmatpush.msrb.mxu0 %v797_v3 }
  0x17   :  { %171 = vmatpush.msra.mxu3 %v910_v19  ;;  %93 = vmatpush.msra.mxu1 %v917_v20 }
  0x18   :  { %286 = vmatpush.msrb.mxu2 %v804_v4  ;;  %207 = vmatpush.msrb.mxu0 %v804_v4 }
  0x19   :  { %172 = vmatpush.msra.mxu3 %v917_v20  ;;  %244 = vmatpush.msrb.mxu1 %v866_v10 }
  0x1a   :  { %287 = vmatpush.msrb.mxu2 %v811_v5  ;;  %208 = vmatpush.msrb.mxu0 %v811_v5 }
  0x1b   :  { %323 = vmatpush.msrb.mxu3 %v866_v10  ;;  %245 = vmatpush.msrb.mxu1 %v871_v11 }
  0x1c   :  { %288 = vmatpush.msrb.mxu2 %v818_v6  ;;  %209 = vmatpush.msrb.mxu0 %v818_v6 }
  0x1d   :  { %324 = vmatpush.msrb.mxu3 %v871_v11  ;;  %246 = vmatpush.msrb.mxu1 %v878_v12 }
  0x1e   :  { %289 = vmatpush.msrb.mxu2 %v825_v7  ;;  %210 = vmatpush.msrb.mxu0 %v825_v7 }
  0x1f   :  { %325 = vmatpush.msrb.mxu3 %v878_v12  ;;  %247 = vmatpush.msrb.mxu1 %v885_v13 }
  0x20   :  { %290 = vmatpush.msrb.mxu2 %v832_v8  ;;  %211 = vmatpush.msrb.mxu0 %v832_v8 }
  0x21   :  { %326 = vmatpush.msrb.mxu3 %v885_v13  ;;  %248 = vmatpush.msrb.mxu1 %v898_v17 }
  0x22   :  { %362 = vmatpush.msra.mxu0 %v784_v0 }
  0x23   :  { %327 = vmatpush.msrb.mxu3 %v898_v17  ;;  %249 = vmatpush.msrb.mxu1 %v903_v18 }
  0x24   :  { %363 = vmatpush.msra.mxu0 %v789_v1 }
  0x25   :  { %328 = vmatpush.msrb.mxu3 %v903_v18  ;;  %250 = vmatpush.msrb.mxu1 %v910_v19 }
  0x26   :  { %364 = vmatpush.msra.mxu0 %v797_v3 }
  0x27   :  { %329 = vmatpush.msrb.mxu3 %v910_v19  ;;  %251 = vmatpush.msrb.mxu1 %v917_v20 }
  0x28   :  { %365 = vmatpush.msra.mxu0 %v804_v4 }
  0x29   :  { %330 = vmatpush.msrb.mxu3 %v917_v20 }
  0x2a   :  { %366 = vmatpush.msra.mxu0 %v811_v5 }
  0x2c   :  { %367 = vmatpush.msra.mxu0 %v818_v6 }
  0x2e   :  { %368 = vmatpush.msra.mxu0 %v825_v7 }
  0x30   :  { %369 = vmatpush.msra.mxu0 %v832_v8 }
  0x8e   :  { %v55_v15 = vpop.f32.mrf.mxu0 }
  0x8f   :  { %v58_v16 = vadd.f32 %v55_v15, %v24_v14  ;;  %v696_v14 = vld [vmem:[%s1090_s1 + $0x30] sm:$0xff] }
  0x91   :  { %60 = vrot.lane.b32.xlu0 %v58_v16, %s752_s14 }
 0x103   :  { %v61_v21 = vpop.permute.xlu0 %60 }
 0x104   :  { %64 = vst.msk [vmem:[#allocation2] sm:$0xff] %vm63_vm1, %v61_v21 }
 0x10b   :  { %v66_v22 = vld [vmem:[#allocation2] sm:$0xff] }
 0x10c   :  { %675 = vmatmul.msk.f32.vlgmr.msra.gmra.mxu1 %vm22_vm0, %v66_v22 }
 0x10d   :  { %402 = vmatpush.msra.mxu1 %v866_v10 }
 0x10f   :  { %403 = vmatpush.msra.mxu1 %v871_v11 }
 0x111   :  { %404 = vmatpush.msra.mxu1 %v878_v12 }
 0x113   :  { %405 = vmatpush.msra.mxu1 %v885_v13 }
 0x115   :  { %406 = vmatpush.msra.mxu1 %v898_v17 }
 0x117   :  { %407 = vmatpush.msra.mxu1 %v903_v18 }
 0x119   :  { %408 = vmatpush.msra.mxu1 %v910_v19 }
 0x11b   :  { %409 = vmatpush.msra.mxu1 %v917_v20 }
 0x189   :  { %v95_v24 = vpop.f32.mrf.mxu1 }
 0x18a   :  { %v98_v25 = vadd.f32 %v95_v24, %v65_v23  ;;  %v700_v24 = vld [vmem:[%s1090_s1 + $0x38] sm:$0xff] }
 0x18c   :  { %709 = vtanh.f32 %v98_v25 }
 0x192   :  { %v710_v26 = vpop.eup %709 }
 0x193   :  { %101 = vst.msk [vmem:[#allocation2] sm:$0xff] %vm100_vm2, %v710_v26 }
 0x194   :  { %102 = vst.msk [vmem:[#allocation3] sm:$0xff] %vm100_vm2, %v710_v26 }
 0x19a   :  { %v105_v27 = vld [vmem:[#allocation2] sm:$0xff] }
 0x19b   :  { %677 = vmatmul.msk.f32.vlgmr.msra.gmra.mxu2 %vm22_vm0, %v105_v27 }
 0x19c   :  { %441 = vmatpush.msra.mxu2 %v784_v0 }
 0x19e   :  { %442 = vmatpush.msra.mxu2 %v789_v1 }
 0x1a0   :  { %443 = vmatpush.msra.mxu2 %v797_v3 }
 0x1a2   :  { %444 = vmatpush.msra.mxu2 %v804_v4 }
 0x1a4   :  { %445 = vmatpush.msra.mxu2 %v811_v5 }
 0x1a6   :  { %446 = vmatpush.msra.mxu2 %v818_v6 }
 0x1a8   :  { %447 = vmatpush.msra.mxu2 %v825_v7 }
 0x1aa   :  { %448 = vmatpush.msra.mxu2 %v832_v8 }
 0x21e   :  { %v134_v29 = vpop.f32.mrf.mxu2 }
 0x21f   :  { %v137_v30 = vadd.f32 %v676_v28, %v134_v29  ;;  %v702_v29 = vld [vmem:[%s1089_s0 + $0x38] sm:$0xff] }
 0x221   :  { %139 = vrot.lane.b32.xlu0 %v137_v30, %s752_s14 }
 0x293   :  { %v140_v31 = vpop.permute.xlu0 %139 }
 0x294   :  { %142 = vst.msk [vmem:[#allocation2] sm:$0xff] %vm63_vm1, %v140_v31 }
 0x29b   :  { %v145_v32 = vld [vmem:[#allocation2] sm:$0xff] }
 0x29c   :  { %679 = vmatmul.msk.f32.vlgmr.msra.gmra.mxu3 %vm22_vm0, %v145_v32 }
 0x29d   :  { %481 = vmatpush.msra.mxu3 %v866_v10 }
 0x29f   :  { %482 = vmatpush.msra.mxu3 %v871_v11 }
 0x2a1   :  { %483 = vmatpush.msra.mxu3 %v878_v12 }
 0x2a3   :  { %484 = vmatpush.msra.mxu3 %v885_v13 }
 0x2a5   :  { %485 = vmatpush.msra.mxu3 %v898_v17 }
 0x2a7   :  { %486 = vmatpush.msra.mxu3 %v903_v18 }
 0x2a9   :  { %487 = vmatpush.msra.mxu3 %v910_v19 }
 0x2ab   :  { %488 = vmatpush.msra.mxu3 %v917_v20 }
 0x31f   :  { %v174_v34 = vpop.f32.mrf.mxu3 }
 0x320   :  { %v177_v35 = vadd.f32 %v678_v33, %v174_v34 }
 0x322   :  { %711 = vtanh.f32 %v177_v35 }
 0x328   :  { %v712_v36 = vpop.eup %711 }
 0x329   :  { %179 = vst.msk [vmem:[#allocation2] sm:$0xff] %vm100_vm2, %v712_v36 }
 0x32a   :  { %181 = vst.msk [vmem:[#allocation3 + $0x8] sm:$0xff] %vm100_vm2, %v712_v36 }
 0x330   :  { %v184_v37 = vld [vmem:[#allocation2] sm:$0xff] }
 0x331   :  { %681 = vmatmul.msk.f32.vlgmr.msrb.gmra.mxu0 %vm22_vm0, %v184_v37 }
 0x332   :  { %520 = vmatpush.msrb.mxu0 %v784_v0 }
 0x334   :  { %521 = vmatpush.msrb.mxu0 %v789_v1 }
 0x336   :  { %522 = vmatpush.msrb.mxu0 %v797_v3 }
 0x338   :  { %523 = vmatpush.msrb.mxu0 %v804_v4 }
 0x33a   :  { %524 = vmatpush.msrb.mxu0 %v811_v5 }
 0x33c   :  { %525 = vmatpush.msrb.mxu0 %v818_v6 }
 0x33e   :  { %526 = vmatpush.msrb.mxu0 %v825_v7 }
 0x340   :  { %527 = vmatpush.msrb.mxu0 %v832_v8 }
 0x3ae   :  { %v213_v39 = vpop.f32.mrf.mxu0 }
 0x3af   :  { %v216_v40 = vadd.f32 %v680_v38, %v213_v39 }
 0x3b1   :  { %218 = vrot.lane.b32.xlu1 %v216_v40, %s752_s14 }
 0x423   :  { %v219_v41 = vpop.permute.xlu1 %218 }
 0x424   :  { %221 = vst.msk [vmem:[#allocation2] sm:$0xff] %vm63_vm1, %v219_v41 }
 0x42b   :  { %v224_v42 = vld [vmem:[#allocation2] sm:$0xff] }
 0x42c   :  { %683 = vmatmul.msk.f32.vlgmr.msrb.gmra.mxu1 %vm22_vm0, %v224_v42 }
 0x42d   :  { %560 = vmatpush.msrb.mxu1 %v866_v10 }
 0x42f   :  { %561 = vmatpush.msrb.mxu1 %v871_v11 }
 0x431   :  { %562 = vmatpush.msrb.mxu1 %v878_v12 }
 0x433   :  { %563 = vmatpush.msrb.mxu1 %v885_v13 }
 0x435   :  { %564 = vmatpush.msrb.mxu1 %v898_v17 }
 0x437   :  { %565 = vmatpush.msrb.mxu1 %v903_v18 }
 0x439   :  { %566 = vmatpush.msrb.mxu1 %v910_v19 }
 0x43b   :  { %567 = vmatpush.msrb.mxu1 %v917_v20 }
 0x4a9   :  { %v253_v44 = vpop.f32.mrf.mxu1 }
 0x4aa   :  { %v256_v45 = vadd.f32 %v682_v43, %v253_v44 }
 0x4ac   :  { %713 = vtanh.f32 %v256_v45 }
 0x4b2   :  { %v714_v46 = vpop.eup %713 }
 0x4b3   :  { %258 = vst.msk [vmem:[#allocation2] sm:$0xff] %vm100_vm2, %v714_v46 }
 0x4b4   :  { %260 = vst.msk [vmem:[#allocation3 + $0x10] sm:$0xff] %vm100_vm2, %v714_v46 }
 0x4ba   :  { %v263_v47 = vld [vmem:[#allocation2] sm:$0xff] }
 0x4bb   :  { %685 = vmatmul.msk.f32.vlgmr.msrb.gmra.mxu2 %vm22_vm0, %v263_v47 }
 0x4bc   :  { %599 = vmatpush.msrb.mxu2 %v784_v0 }
 0x4be   :  { %600 = vmatpush.msrb.mxu2 %v789_v1 }
 0x4c0   :  { %601 = vmatpush.msrb.mxu2 %v797_v3 }
 0x4c2   :  { %602 = vmatpush.msrb.mxu2 %v804_v4  ;;  %v692_v4 = vld [vmem:[%s1090_s1 + $0x28] sm:$0xff] }
 0x4c4   :  { %603 = vmatpush.msrb.mxu2 %v811_v5 }
 0x4c6   :  { %604 = vmatpush.msrb.mxu2 %v818_v6 }
 0x4c8   :  { %605 = vmatpush.msrb.mxu2 %v825_v7 }
 0x4ca   :  { %606 = vmatpush.msrb.mxu2 %v832_v8 }
 0x53e   :  { %v292_v49 = vpop.f32.mrf.mxu2 }
 0x53f   :  { %v295_v50 = vadd.f32 %v684_v48, %v292_v49 }
 0x541   :  { %297 = vrot.lane.b32.xlu1 %v295_v50, %s752_s14 }
 0x5b3   :  { %v298_v51 = vpop.permute.xlu1 %297 }
 0x5b4   :  { %300 = vst.msk [vmem:[#allocation2] sm:$0xff] %vm63_vm1, %v298_v51 }
 0x5bb   :  { %v303_v52 = vld [vmem:[#allocation2] sm:$0xff] }
 0x5bc   :  { %687 = vmatmul.msk.f32.vlgmr.msrb.gmra.mxu3 %vm22_vm0, %v303_v52 }
 0x5bd   :  { %639 = vmatpush.msrb.mxu3 %v866_v10 }
 0x5bf   :  { %640 = vmatpush.msrb.mxu3 %v871_v11 }
 0x5c1   :  { %641 = vmatpush.msrb.mxu3 %v878_v12 }
 0x5c3   :  { %642 = vmatpush.msrb.mxu3 %v885_v13 }
 0x5c5   :  { %643 = vmatpush.msrb.mxu3 %v898_v17 }
 0x5c7   :  { %644 = vmatpush.msrb.mxu3 %v903_v18 }
 0x5c9   :  { %645 = vmatpush.msrb.mxu3 %v910_v19  ;;  %v698_v19 = vld [vmem:[%s1089_s0 + $0x30] sm:$0xff] }
 0x5cb   :  { %646 = vmatpush.msrb.mxu3 %v917_v20 }
 0x63f   :  { %v332_v54 = vpop.f32.mrf.mxu3 }
 0x640   :  { %v335_v55 = vadd.f32 %v686_v53, %v332_v54 }
 0x642   :  { %715 = vtanh.f32 %v335_v55 }
 0x648   :  { %v716_v56 = vpop.eup %715 }
 0x649   :  { %337 = vst.msk [vmem:[#allocation2] sm:$0xff] %vm100_vm2, %v716_v56 }
 0x64a   :  { %339 = vst.msk [vmem:[#allocation3 + $0x18] sm:$0xff] %vm100_vm2, %v716_v56 }
 0x650   :  { %v342_v57 = vld [vmem:[#allocation2] sm:$0xff] }
 0x651   :  { %689 = vmatmul.msk.f32.vlgmr.msra.gmra.mxu0 %vm22_vm0, %v342_v57 }
 0x6ce   :  { %v371_v59 = vpop.f32.mrf.mxu0 }
 0x6cf   :  { %v374_v60 = vadd.f32 %v688_v58, %v371_v59 }
 0x6d1   :  { %376 = vrot.lane.b32.xlu2 %v374_v60, %s752_s14 }
 0x72b   :  { %v377_v61 = vpop.permute.xlu2 %376 }
 0x72c   :  { %379 = vst.msk [vmem:[#allocation2] sm:$0xff] %vm63_vm1, %v377_v61 }
 0x733   :  { %v382_v62 = vld [vmem:[#allocation2] sm:$0xff] }
 0x734   :  { %691 = vmatmul.msk.f32.vlgmr.msra.gmra.mxu1 %vm22_vm0, %v382_v62 }
 0x7b1   :  { %v411_v0 = vpop.f32.mrf.mxu1 }
 0x7b2   :  { %v414_v1 = vadd.f32 %v690_v63, %v411_v0 }
 0x7b4   :  { %717 = vtanh.f32 %v414_v1 }
 0x7ba   :  { %v718_v2 = vpop.eup %717 }
 0x7bb   :  { %416 = vst.msk [vmem:[#allocation2] sm:$0xff] %vm100_vm2, %v718_v2 }
 0x7bc   :  { %418 = vst.msk [vmem:[#allocation3 + $0x20] sm:$0xff] %vm100_vm2, %v718_v2 }
 0x7c2   :  { %v421_v3 = vld [vmem:[#allocation2] sm:$0xff] }
 0x7c3   :  { %693 = vmatmul.msk.f32.vlgmr.msra.gmra.mxu2 %vm22_vm0, %v421_v3 }
 0x846   :  { %v450_v5 = vpop.f32.mrf.mxu2 }
 0x847   :  { %v453_v6 = vadd.f32 %v692_v4, %v450_v5 }
 0x849   :  { %455 = vrot.lane.b32.xlu2 %v453_v6, %s752_s14 }
 0x8a3   :  { %v456_v7 = vpop.permute.xlu2 %455 }
 0x8a4   :  { %458 = vst.msk [vmem:[#allocation2] sm:$0xff] %vm63_vm1, %v456_v7 }
 0x8ab   :  { %v461_v8 = vld [vmem:[#allocation2] sm:$0xff] }
 0x8ac   :  { %695 = vmatmul.msk.f32.vlgmr.msra.gmra.mxu3 %vm22_vm0, %v461_v8 }
 0x92f   :  { %v490_v10 = vpop.f32.mrf.mxu3 }
 0x930   :  { %v493_v11 = vadd.f32 %v694_v9, %v490_v10 }
 0x932   :  { %719 = vtanh.f32 %v493_v11 }
 0x938   :  { %v720_v12 = vpop.eup %719 }
 0x939   :  { %495 = vst.msk [vmem:[#allocation2] sm:$0xff] %vm100_vm2, %v720_v12 }
 0x93a   :  { %497 = vst.msk [vmem:[#allocation3 + $0x28] sm:$0xff] %vm100_vm2, %v720_v12 }
 0x940   :  { %v500_v13 = vld [vmem:[#allocation2] sm:$0xff] }
 0x941   :  { %697 = vmatmul.msk.f32.vlgmr.msrb.gmra.mxu0 %vm22_vm0, %v500_v13 }
 0x9be   :  { %v529_v15 = vpop.f32.mrf.mxu0 }
 0x9bf   :  { %v532_v16 = vadd.f32 %v696_v14, %v529_v15 }
 0x9c1   :  { %534 = vrot.lane.b32.xlu0 %v532_v16, %s752_s14 }
 0xa33   :  { %v535_v17 = vpop.permute.xlu0 %534 }
 0xa34   :  { %537 = vst.msk [vmem:[#allocation2] sm:$0xff] %vm63_vm1, %v535_v17 }
 0xa3b   :  { %v540_v18 = vld [vmem:[#allocation2] sm:$0xff] }
 0xa3c   :  { %699 = vmatmul.msk.f32.vlgmr.msrb.gmra.mxu1 %vm22_vm0, %v540_v18 }
 0xab9   :  { %v569_v20 = vpop.f32.mrf.mxu1 }
 0xaba   :  { %v572_v21 = vadd.f32 %v698_v19, %v569_v20 }
 0xabc   :  { %721 = vtanh.f32 %v572_v21 }
 0xac2   :  { %v722_v22 = vpop.eup %721 }
 0xac3   :  { %574 = vst.msk [vmem:[#allocation2] sm:$0xff] %vm100_vm2, %v722_v22 }
 0xac4   :  { %576 = vst.msk [vmem:[#allocation3 + $0x30] sm:$0xff] %vm100_vm2, %v722_v22 }
 0xaca   :  { %v579_v23 = vld [vmem:[#allocation2] sm:$0xff] }
 0xacb   :  { %701 = vmatmul.msk.f32.vlgmr.msrb.gmra.mxu2 %vm22_vm0, %v579_v23 }
 0xb4e   :  { %v608_v25 = vpop.f32.mrf.mxu2 }
 0xb4f   :  { %v611_v26 = vadd.f32 %v700_v24, %v608_v25 }
 0xb51   :  { %613 = vrot.lane.b32.xlu1 %v611_v26, %s752_s14  ;;  %s754_s14 = smov 128  }
 0xbc3   :  { %v614_v27 = vpop.permute.xlu1 %613 }
 0xbc4   :  { %616 = vst.msk [vmem:[#allocation2] sm:$0xff] %vm63_vm1, %v614_v27 }
 0xbcb   :  { %v619_v28 = vld [vmem:[#allocation2] sm:$0xff] }
 0xbcc   :  { %703 = vmatmul.msk.f32.vlgmr.msrb.gmra.mxu3 %vm22_vm0, %v619_v28 }
 0xc4f   :  { %v648_v30 = vpop.f32.mrf.mxu3 }
 0xc50   :  { %v651_v31 = vadd.f32 %v702_v29, %v648_v30 }
 0xc52   :  { %723 = vtanh.f32 %v651_v31 }
 0xc58   :  { %v724_v32 = vpop.eup %723 }
 0xc59   :  { %653 = vst.msk [vmem:[#allocation2] sm:$0xff] %vm100_vm2, %v724_v32 }
 0xc5a   :  { %655 = vst.msk [vmem:[#allocation3 + $0x38] sm:$0xff] %vm100_vm2, %v724_v32 }
 0xc5b   :  { %668 = dma.vmem_to_hbm [thread:$0]  %s661_s26, 1024, %s663_s28, [#allocation4], %s754_s14, %s754_s14, %s755_s29  }
 0xc5c   :  { %749 = dma.done.wait [#allocation4], 1024  }
 0xc5d   :  { %750 = vsyncadd [#allocation4], 4294966272 }
 0xc5e   :  { %673 = vsyncpa [#allocation4], 1 }

</bundles_post_ra>
